<compile_context>
chip_gen: v7x
topology: tpu7x:2x2x1
jax: 0.10.0
libtpu: 0.0.40
codegen_flags: <defaults>
</compile_context>

<pallas_src>
import jax
import jax.numpy as jnp
import numpy as np
from jax.experimental import pallas as pl
from jax.experimental.pallas import tpu as pltpu

# ---------------------------------------------------------------------------
# model sizes (small, consistent with the PyTorch module's defaults)
# ---------------------------------------------------------------------------
B = 2              # real batch
T = 16             # sequence length (even, so MaxPool1d(2,2) -> T//2)
N_INPUT = 3        # n_input  (Conv1d in_channels)
N_CNN = 16         # n_cnn_hidden (Conv1d out_channels)
N_LSTM = 32        # n_lstm_hidden
N_OUT = 6          # n_output
K = 3              # conv kernel_size (padding = 1, stride = 1)
TP = T // 2        # length after MaxPool1d(2, 2)
BN_EPS = 1e-5

BP = 8             # batch padded to the f32 sublane count
LANES = 4 * N_LSTM                      # 128 — gate width == slab lane width
KC = K * N_INPUT                        # 9
KC_PAD = 16                             # im2col feature axis padded

# packed weight-slab row offsets (every segment starts on an 8-row boundary)
ROW_BIAS = 0                            # row 0: LSTM bias (scaled), row 1: FC bias
ROW_WCOL = 8                            # 16 rows: conv weight  (KC x N_CNN real)
ROW_WIH = ROW_WCOL + KC_PAD             # 24, 128 rows: W_ih^T   (N_CNN real rows)
ROW_WHH = ROW_WIH + LANES               # 152, 32 rows: W_hh^T
ROW_WFC = ROW_WHH + N_LSTM              # 184, 32 rows: (BN-folded) W_fc^T
W_ROWS = ROW_WFC + N_LSTM               # 216


# ---------------------------------------------------------------------------
# Pallas kernel: conv (im2col matmul) + maxpool + batched LSTM + (BN⋅FC)
# ---------------------------------------------------------------------------
def cnn_lstm_kernel(xcol_ref, w_ref, out_ref):
    # xcol_ref : (T*BP, KC_PAD)  time-major im2col'd input, batch padded to BP
    # w_ref    : (W_ROWS, LANES) packed weight slab (see prepare_params)
    # out_ref  : (BP, LANES)     lane-dense output; real data in [:B, :N_OUT]
    H = N_LSTM

    blstm = w_ref[ROW_BIAS:ROW_BIAS + 1, :]                 # (1, 128)  i/f/o pre-scaled
    bfc = w_ref[ROW_BIAS + 1:ROW_BIAS + 2, :]               # (1, 128)  BN folded in
    wcol = w_ref[ROW_WCOL:ROW_WCOL + KC_PAD, :]             # (16, 128) conv weight
    wih = w_ref[ROW_WIH:ROW_WIH + LANES, :]                 # (128, 128) W_ih^T (padded rows 0)
    whh = w_ref[ROW_WHH:ROW_WHH + H, :]                     # (32, 128) W_hh^T
    wfc = w_ref[ROW_WFC:ROW_WFC + H, :]                     # (32, 128) BN-folded W_fc^T

    # Conv1d (padding=1, stride=1) for every (t, b) row in ONE MXU matmul.
    # Bias is folded into the LSTM bias (valid through the maxpool).
    conv = jnp.dot(xcol_ref[...], wcol,
                   preferred_element_type=jnp.float32)       # (T*BP, 128)

    # MaxPool1d(kernel=2, stride=2); each half-group is an aligned (8,128) tile.
    conv3 = conv.reshape(TP, 2 * BP, LANES)
    pooled = jnp.maximum(conv3[:, :BP, :], conv3[:, BP:, :]).reshape(TP * BP, LANES)

    # Hoisted LSTM input projection: one (TP*BP, 128) @ (128, 128) matmul.
    gates_x = jnp.dot(pooled, wih,
                      preferred_element_type=jnp.float32) + blstm   # (TP*BP, 128)

    h = jnp.zeros((BP, H), jnp.float32)
    c = jnp.zeros((BP, H), jnp.float32)

    # Shared batched recurrence, statically unrolled (TP = 8 steps).  Only the
    # (BP, H) @ (H, 4H) recurrent matmul sits on the sequential critical path.
    # Gate slabs gates_x[t*BP:(t+1)*BP] are aligned (8,128) tiles.
    # TODO(synk): hold W_hh resident in the MXU via pltpu.matmul_push_rhs /
    #             matmul_acc_lhs / matmul_pop to avoid re-staging it every step.
    for t in range(TP):
        g = gates_x[t * BP:(t + 1) * BP, :] + jnp.dot(
            h, whh, preferred_element_type=jnp.float32)             # (BP, 128)
        tg = jnp.tanh(g)                      # single full-width EUP pass
        # i/f/o columns were pre-scaled by 0.5: sigmoid(x) = 0.5*tanh(x/2)+0.5
        i_g = 0.5 * tg[:, 0:H] + 0.5
        f_g = 0.5 * tg[:, H:2 * H] + 0.5
        g_g = tg[:, 2 * H:3 * H]
        o_g = 0.5 * tg[:, 3 * H:4 * H] + 0.5
        c = f_g * c + i_g * g_g
        h = o_g * jnp.tanh(c)

    # (BatchNorm ∘ Linear) already folded into wfc / bfc; single lane-dense store.
    out_ref[...] = jnp.dot(h, wfc, preferred_element_type=jnp.float32) + bfc


# ---------------------------------------------------------------------------
# one-time parameter packing (constant folds + single VMEM slab)
# ---------------------------------------------------------------------------
def prepare_params(params):
    # Conv weight (Cout, Cin, K) -> (K*Cin, Cout), (k, ci)-major rows.
    w_col = jnp.transpose(params["w_conv"], (2, 1, 0)).reshape(KC, N_CNN)

    wih_t = params["w_ih"].T.astype(jnp.float32)             # (Cout, 4H)
    whh_t = params["w_hh"].T.astype(jnp.float32)             # (H, 4H)
    # Fold conv bias through the maxpool into the LSTM bias:
    #   max_t(a_t + b_c) = max_t(a_t) + b_c  per channel.
    blstm = params["b_ih"] + params["b_hh"] + params["b_conv"] @ wih_t   # (4H,)

    # Pre-scale the i/f/o gate columns by 0.5 (sigmoid(x) = 0.5*tanh(x/2)+0.5).
    gate_scale = jnp.concatenate([
        jnp.full((2 * N_LSTM,), 0.5, jnp.float32),   # i, f
        jnp.ones((N_LSTM,), jnp.float32),            # g (tanh, unscaled)
        jnp.full((N_LSTM,), 0.5, jnp.float32),       # o
    ])
    wih_s = wih_t * gate_scale[None, :]
    whh_s = whh_t * gate_scale[None, :]
    blstm_s = blstm * gate_scale

    # Fold eval-mode BatchNorm (running_mean=0, running_var=1) into the FC.
    bn_scale = params["gamma"] / jnp.sqrt(1.0 + BN_EPS)      # (H,)
    wfc_t = params["w_fc"].T.astype(jnp.float32)              # (H, n_out)
    wfc_bn = bn_scale[:, None] * wfc_t                        # (H, n_out)
    bfc_eff = params["b_fc"] + params["beta"] @ wfc_t         # (n_out,)

    slab = jnp.zeros((W_ROWS, LANES), jnp.float32)
    slab = slab.at[ROW_BIAS, :4 * N_LSTM].set(blstm_s)
    slab = slab.at[ROW_BIAS + 1, :N_OUT].set(bfc_eff)
    slab = slab.at[ROW_WCOL:ROW_WCOL + KC, :N_CNN].set(w_col)
    slab = slab.at[ROW_WIH:ROW_WIH + N_CNN, :4 * N_LSTM].set(wih_s)
    slab = slab.at[ROW_WHH:ROW_WHH + N_LSTM, :4 * N_LSTM].set(whh_s)
    slab = slab.at[ROW_WFC:ROW_WFC + N_LSTM, :N_OUT].set(wfc_bn)
    return slab


# ---------------------------------------------------------------------------
# per-call wrapper: im2col / batch-pad glue in plain JAX, compute in Pallas
# ---------------------------------------------------------------------------
def cnn_lstm_forward(x, w_slab):
    Bx, Tx, _ = x.shape

    # im2col (zero-padded conv window unrolled onto the feature axis); batch
    # padded to BP=8 with zero rows (independent, sliced off at the end).
    x_pad = jnp.pad(x.astype(jnp.float32), ((0, BP - Bx), (1, 1), (0, 0)))
    x_col = jnp.concatenate([x_pad[:, k:k + Tx, :] for k in range(K)],
                            axis=-1)                                  # (BP, T, KC)
    x_col_tm = jnp.transpose(x_col, (1, 0, 2)).reshape(Tx * BP, KC)   # row = t*BP + b
    x_col_tm = jnp.pad(x_col_tm, ((0, 0), (0, KC_PAD - KC)))          # (T*BP, 16)

    out = pl.pallas_call(
        cnn_lstm_kernel,
        out_shape=jax.ShapeDtypeStruct((BP, LANES), jnp.float32),
        in_specs=[pl.BlockSpec(memory_space=pltpu.MemorySpace.VMEM),
                  pl.BlockSpec(memory_space=pltpu.MemorySpace.VMEM)],
        out_specs=pl.BlockSpec(memory_space=pltpu.MemorySpace.VMEM),
    )(x_col_tm, w_slab)
    return out[:Bx, :N_OUT]


# ---------------------------------------------------------------------------
# pure-JAX reference (for correctness check only)
# ---------------------------------------------------------------------------
def reference_forward(x, params):
    # Conv1d NCL
    x_ncl = jnp.transpose(x, (0, 2, 1))                       # (B, Cin, T)
    y = jax.lax.conv_general_dilated(
        x_ncl, params["w_conv"], window_strides=(1,), padding=((1, 1),),
        dimension_numbers=("NCH", "OIH", "NCH"))
    y = y + params["b_conv"][None, :, None]                   # (B, Cout, T)
    # MaxPool1d(2,2)
    y = y.reshape(B, N_CNN, TP, 2).max(axis=-1)                # (B, Cout, Tp)
    seq = jnp.transpose(y, (0, 2, 1))                          # (B, Tp, Cout)

    Wih, Whh = params["w_ih"], params["w_hh"]
    bih, bhh = params["b_ih"], params["b_hh"]
    H = N_LSTM

    def step(carry, x_t):
        h, c = carry
        g = x_t @ Wih.T + bih + h @ Whh.T + bhh
        i = jax.nn.sigmoid(g[:, 0:H])
        f = jax.nn.sigmoid(g[:, H:2 * H])
        gg = jnp.tanh(g[:, 2 * H:3 * H])
        o = jax.nn.sigmoid(g[:, 3 * H:4 * H])
        c = f * c + i * gg
        h = o * jnp.tanh(c)
        return (h, c), None

    h0 = jnp.zeros((B, H), jnp.float32)
    c0 = jnp.zeros((B, H), jnp.float32)
    (h_last, _), _ = jax.lax.scan(step, (h0, c0), jnp.swapaxes(seq, 0, 1))

    h_bn = h_last / jnp.sqrt(1.0 + BN_EPS) * params["gamma"] + params["beta"]
    return h_bn @ params["w_fc"].T + params["b_fc"]


# ---------------------------------------------------------------------------
# deterministic parameter init
# ---------------------------------------------------------------------------
def make_params(key):
    ks = jax.random.split(key, 10)
    u = lambda k, shape, s=0.1: jax.random.uniform(k, shape, jnp.float32, -s, s)
    return {
        "w_conv": u(ks[0], (N_CNN, N_INPUT, K)),
        "b_conv": u(ks[1], (N_CNN,)),
        "w_ih":   u(ks[2], (4 * N_LSTM, N_CNN)),
        "w_hh":   u(ks[3], (4 * N_LSTM, N_LSTM)),
        "b_ih":   u(ks[4], (4 * N_LSTM,)),
        "b_hh":   u(ks[5], (4 * N_LSTM,)),
        "gamma":  jax.random.uniform(ks[6], (N_LSTM,), jnp.float32, 0.5, 1.5),
        "beta":   u(ks[7], (N_LSTM,)),
        "w_fc":   u(ks[8], (N_OUT, N_LSTM)),
        "b_fc":   u(ks[9], (N_OUT,)),
    }


if __name__ == "__main__":
    key = jax.random.PRNGKey(0)
    k_x, k_p = jax.random.split(key)
    x = jax.random.normal(k_x, (B, T, N_INPUT), dtype=jnp.float32)
    params = make_params(k_p)

    w_slab = jax.block_until_ready(prepare_params(params))   # one-time packing

    fwd = jax.jit(cnn_lstm_forward)
    out = jax.block_until_ready(fwd(x, w_slab))

    ref = jax.block_until_ready(reference_forward(x, params))
    np.testing.assert_allclose(np.asarray(out), np.asarray(ref),
                               rtol=5e-3, atol=5e-3)
    assert out.shape == (B, N_OUT)
    print("KERNEL_OK")
</pallas_src>

<mosaic_0001>
module attributes {stable_mosaic.version = 11 : i64} {
  func.func @cnn_lstm_kernel(%arg0: memref<128x16xf32, #tpu.memory_space<vmem>>, %arg1: memref<216x128xf32, #tpu.memory_space<vmem>>, %arg2: memref<8x128xf32, #tpu.memory_space<vmem>>) attributes {dimension_semantics = [], scalar_prefetch = 0 : i64, scratch_operands = 0 : i64, tpu.core_type = #tpu.core_type<tc>} {
    %c0 = arith.constant 0 : index
    %c0_0 = arith.constant 0 : index
    %0 = vector.load %arg1[%c0, %c0_0] : memref<216x128xf32, #tpu.memory_space<vmem>>, vector<1x128xf32>
    %c1 = arith.constant 1 : index
    %c0_1 = arith.constant 0 : index
    %1 = vector.load %arg1[%c1, %c0_1] : memref<216x128xf32, #tpu.memory_space<vmem>>, vector<1x128xf32>
    %c8 = arith.constant 8 : index
    %c0_2 = arith.constant 0 : index
    %2 = vector.load %arg1[%c8, %c0_2] : memref<216x128xf32, #tpu.memory_space<vmem>>, vector<16x128xf32>
    %c24 = arith.constant 24 : index
    %c0_3 = arith.constant 0 : index
    %3 = vector.load %arg1[%c24, %c0_3] : memref<216x128xf32, #tpu.memory_space<vmem>>, vector<128x128xf32>
    %c152 = arith.constant 152 : index
    %c0_4 = arith.constant 0 : index
    %4 = vector.load %arg1[%c152, %c0_4] : memref<216x128xf32, #tpu.memory_space<vmem>>, vector<32x128xf32>
    %c184 = arith.constant 184 : index
    %c0_5 = arith.constant 0 : index
    %5 = vector.load %arg1[%c184, %c0_5] : memref<216x128xf32, #tpu.memory_space<vmem>>, vector<32x128xf32>
    %c0_6 = arith.constant 0 : index
    %c0_7 = arith.constant 0 : index
    %6 = vector.load %arg0[%c0_6, %c0_7] : memref<128x16xf32, #tpu.memory_space<vmem>>, vector<128x16xf32>
    %cst = arith.constant dense<0.000000e+00> : vector<128x128xf32>
    %7 = tpu.matmul %6, %2, %cst {dimension_numbers = #tpu.dot_dimension_numbers<[1], [0], [0], [1], [0, 0, 1, 1], [], []>} : vector<128x16xf32>, vector<16x128xf32>, vector<128x128xf32> -> vector<128x128xf32>
    %8 = vector.shape_cast %7 : vector<128x128xf32> to vector<8x16x128xf32>
    %9 = vector.extract_strided_slice %8 {offsets = [0, 0, 0], sizes = [8, 8, 128], strides = [1, 1, 1]} : vector<8x16x128xf32> to vector<8x8x128xf32>
    %10 = vector.extract_strided_slice %8 {offsets = [0, 8, 0], sizes = [8, 8, 128], strides = [1, 1, 1]} : vector<8x16x128xf32> to vector<8x8x128xf32>
    %11 = arith.maximumf %9, %10 : vector<8x8x128xf32>
    %12 = vector.shape_cast %11 : vector<8x8x128xf32> to vector<64x128xf32>
    %cst_8 = arith.constant dense<0.000000e+00> : vector<64x128xf32>
    %13 = tpu.matmul %12, %3, %cst_8 {dimension_numbers = #tpu.dot_dimension_numbers<[1], [0], [0], [1], [0, 0, 1, 1], [], []>} : vector<64x128xf32>, vector<128x128xf32>, vector<64x128xf32> -> vector<64x128xf32>
    %14 = vector.broadcast %0 : vector<1x128xf32> to vector<64x128xf32>
    %15 = arith.addf %13, %14 : vector<64x128xf32>
    %cst_9 = arith.constant 0.000000e+00 : f32
    %16 = vector.broadcast %cst_9 : f32 to vector<8x32xf32>
    %cst_10 = arith.constant 0.000000e+00 : f32
    %17 = vector.broadcast %cst_10 : f32 to vector<8x32xf32>
    %18 = vector.extract_strided_slice %15 {offsets = [0, 0], sizes = [8, 128], strides = [1, 1]} : vector<64x128xf32> to vector<8x128xf32>
    %cst_11 = arith.constant dense<0.000000e+00> : vector<8x128xf32>
    %19 = tpu.matmul %16, %4, %cst_11 {dimension_numbers = #tpu.dot_dimension_numbers<[1], [0], [0], [1], [0, 0, 1, 1], [], []>} : vector<8x32xf32>, vector<32x128xf32>, vector<8x128xf32> -> vector<8x128xf32>
    %20 = arith.addf %18, %19 : vector<8x128xf32>
    %21 = math.tanh %20 : vector<8x128xf32>
    %22 = vector.extract_strided_slice %21 {offsets = [0, 0], sizes = [8, 32], strides = [1, 1]} : vector<8x128xf32> to vector<8x32xf32>
    %cst_12 = arith.constant 5.000000e-01 : f32
    %23 = vector.broadcast %cst_12 : f32 to vector<8x32xf32>
    %24 = arith.mulf %23, %22 : vector<8x32xf32>
    %cst_13 = arith.constant 5.000000e-01 : f32
    %25 = vector.broadcast %cst_13 : f32 to vector<8x32xf32>
    %26 = arith.addf %24, %25 : vector<8x32xf32>
    %27 = vector.extract_strided_slice %21 {offsets = [0, 32], sizes = [8, 32], strides = [1, 1]} : vector<8x128xf32> to vector<8x32xf32>
    %cst_14 = arith.constant 5.000000e-01 : f32
    %28 = vector.broadcast %cst_14 : f32 to vector<8x32xf32>
    %29 = arith.mulf %28, %27 : vector<8x32xf32>
    %cst_15 = arith.constant 5.000000e-01 : f32
    %30 = vector.broadcast %cst_15 : f32 to vector<8x32xf32>
    %31 = arith.addf %29, %30 : vector<8x32xf32>
    %32 = vector.extract_strided_slice %21 {offsets = [0, 64], sizes = [8, 32], strides = [1, 1]} : vector<8x128xf32> to vector<8x32xf32>
    %33 = vector.extract_strided_slice %21 {offsets = [0, 96], sizes = [8, 32], strides = [1, 1]} : vector<8x128xf32> to vector<8x32xf32>
    %cst_16 = arith.constant 5.000000e-01 : f32
    %34 = vector.broadcast %cst_16 : f32 to vector<8x32xf32>
    %35 = arith.mulf %34, %33 : vector<8x32xf32>
    %cst_17 = arith.constant 5.000000e-01 : f32
    %36 = vector.broadcast %cst_17 : f32 to vector<8x32xf32>
    %37 = arith.addf %35, %36 : vector<8x32xf32>
    %38 = arith.mulf %31, %17 : vector<8x32xf32>
    %39 = arith.mulf %26, %32 : vector<8x32xf32>
    %40 = arith.addf %38, %39 : vector<8x32xf32>
    %41 = math.tanh %40 : vector<8x32xf32>
    %42 = arith.mulf %37, %41 : vector<8x32xf32>
    %43 = vector.extract_strided_slice %15 {offsets = [8, 0], sizes = [8, 128], strides = [1, 1]} : vector<64x128xf32> to vector<8x128xf32>
    %cst_18 = arith.constant dense<0.000000e+00> : vector<8x128xf32>
    %44 = tpu.matmul %42, %4, %cst_18 {dimension_numbers = #tpu.dot_dimension_numbers<[1], [0], [0], [1], [0, 0, 1, 1], [], []>} : vector<8x32xf32>, vector<32x128xf32>, vector<8x128xf32> -> vector<8x128xf32>
    %45 = arith.addf %43, %44 : vector<8x128xf32>
    %46 = math.tanh %45 : vector<8x128xf32>
    %47 = vector.extract_strided_slice %46 {offsets = [0, 0], sizes = [8, 32], strides = [1, 1]} : vector<8x128xf32> to vector<8x32xf32>
    %cst_19 = arith.constant 5.000000e-01 : f32
    %48 = vector.broadcast %cst_19 : f32 to vector<8x32xf32>
    %49 = arith.mulf %48, %47 : vector<8x32xf32>
    %cst_20 = arith.constant 5.000000e-01 : f32
    %50 = vector.broadcast %cst_20 : f32 to vector<8x32xf32>
    %51 = arith.addf %49, %50 : vector<8x32xf32>
    %52 = vector.extract_strided_slice %46 {offsets = [0, 32], sizes = [8, 32], strides = [1, 1]} : vector<8x128xf32> to vector<8x32xf32>
    %cst_21 = arith.constant 5.000000e-01 : f32
    %53 = vector.broadcast %cst_21 : f32 to vector<8x32xf32>
    %54 = arith.mulf %53, %52 : vector<8x32xf32>
    %cst_22 = arith.constant 5.000000e-01 : f32
    %55 = vector.broadcast %cst_22 : f32 to vector<8x32xf32>
    %56 = arith.addf %54, %55 : vector<8x32xf32>
    %57 = vector.extract_strided_slice %46 {offsets = [0, 64], sizes = [8, 32], strides = [1, 1]} : vector<8x128xf32> to vector<8x32xf32>
    %58 = vector.extract_strided_slice %46 {offsets = [0, 96], sizes = [8, 32], strides = [1, 1]} : vector<8x128xf32> to vector<8x32xf32>
    %cst_23 = arith.constant 5.000000e-01 : f32
    %59 = vector.broadcast %cst_23 : f32 to vector<8x32xf32>
    %60 = arith.mulf %59, %58 : vector<8x32xf32>
    %cst_24 = arith.constant 5.000000e-01 : f32
    %61 = vector.broadcast %cst_24 : f32 to vector<8x32xf32>
    %62 = arith.addf %60, %61 : vector<8x32xf32>
    %63 = arith.mulf %56, %40 : vector<8x32xf32>
    %64 = arith.mulf %51, %57 : vector<8x32xf32>
    %65 = arith.addf %63, %64 : vector<8x32xf32>
    %66 = math.tanh %65 : vector<8x32xf32>
    %67 = arith.mulf %62, %66 : vector<8x32xf32>
    %68 = vector.extract_strided_slice %15 {offsets = [16, 0], sizes = [8, 128], strides = [1, 1]} : vector<64x128xf32> to vector<8x128xf32>
    %cst_25 = arith.constant dense<0.000000e+00> : vector<8x128xf32>
    %69 = tpu.matmul %67, %4, %cst_25 {dimension_numbers = #tpu.dot_dimension_numbers<[1], [0], [0], [1], [0, 0, 1, 1], [], []>} : vector<8x32xf32>, vector<32x128xf32>, vector<8x128xf32> -> vector<8x128xf32>
    %70 = arith.addf %68, %69 : vector<8x128xf32>
    %71 = math.tanh %70 : vector<8x128xf32>
    %72 = vector.extract_strided_slice %71 {offsets = [0, 0], sizes = [8, 32], strides = [1, 1]} : vector<8x128xf32> to vector<8x32xf32>
    %cst_26 = arith.constant 5.000000e-01 : f32
    %73 = vector.broadcast %cst_26 : f32 to vector<8x32xf32>
    %74 = arith.mulf %73, %72 : vector<8x32xf32>
    %cst_27 = arith.constant 5.000000e-01 : f32
    %75 = vector.broadcast %cst_27 : f32 to vector<8x32xf32>
    %76 = arith.addf %74, %75 : vector<8x32xf32>
    %77 = vector.extract_strided_slice %71 {offsets = [0, 32], sizes = [8, 32], strides = [1, 1]} : vector<8x128xf32> to vector<8x32xf32>
    %cst_28 = arith.constant 5.000000e-01 : f32
    %78 = vector.broadcast %cst_28 : f32 to vector<8x32xf32>
    %79 = arith.mulf %78, %77 : vector<8x32xf32>
    %cst_29 = arith.constant 5.000000e-01 : f32
    %80 = vector.broadcast %cst_29 : f32 to vector<8x32xf32>
    %81 = arith.addf %79, %80 : vector<8x32xf32>
    %82 = vector.extract_strided_slice %71 {offsets = [0, 64], sizes = [8, 32], strides = [1, 1]} : vector<8x128xf32> to vector<8x32xf32>
    %83 = vector.extract_strided_slice %71 {offsets = [0, 96], sizes = [8, 32], strides = [1, 1]} : vector<8x128xf32> to vector<8x32xf32>
    %cst_30 = arith.constant 5.000000e-01 : f32
    %84 = vector.broadcast %cst_30 : f32 to vector<8x32xf32>
    %85 = arith.mulf %84, %83 : vector<8x32xf32>
    %cst_31 = arith.constant 5.000000e-01 : f32
    %86 = vector.broadcast %cst_31 : f32 to vector<8x32xf32>
    %87 = arith.addf %85, %86 : vector<8x32xf32>
    %88 = arith.mulf %81, %65 : vector<8x32xf32>
    %89 = arith.mulf %76, %82 : vector<8x32xf32>
    %90 = arith.addf %88, %89 : vector<8x32xf32>
    %91 = math.tanh %90 : vector<8x32xf32>
    %92 = arith.mulf %87, %91 : vector<8x32xf32>
    %93 = vector.extract_strided_slice %15 {offsets = [24, 0], sizes = [8, 128], strides = [1, 1]} : vector<64x128xf32> to vector<8x128xf32>
    %cst_32 = arith.constant dense<0.000000e+00> : vector<8x128xf32>
    %94 = tpu.matmul %92, %4, %cst_32 {dimension_numbers = #tpu.dot_dimension_numbers<[1], [0], [0], [1], [0, 0, 1, 1], [], []>} : vector<8x32xf32>, vector<32x128xf32>, vector<8x128xf32> -> vector<8x128xf32>
    %95 = arith.addf %93, %94 : vector<8x128xf32>
    %96 = math.tanh %95 : vector<8x128xf32>
    %97 = vector.extract_strided_slice %96 {offsets = [0, 0], sizes = [8, 32], strides = [1, 1]} : vector<8x128xf32> to vector<8x32xf32>
    %cst_33 = arith.constant 5.000000e-01 : f32
    %98 = vector.broadcast %cst_33 : f32 to vector<8x32xf32>
    %99 = arith.mulf %98, %97 : vector<8x32xf32>
    %cst_34 = arith.constant 5.000000e-01 : f32
    %100 = vector.broadcast %cst_34 : f32 to vector<8x32xf32>
    %101 = arith.addf %99, %100 : vector<8x32xf32>
    %102 = vector.extract_strided_slice %96 {offsets = [0, 32], sizes = [8, 32], strides = [1, 1]} : vector<8x128xf32> to vector<8x32xf32>
    %cst_35 = arith.constant 5.000000e-01 : f32
    %103 = vector.broadcast %cst_35 : f32 to vector<8x32xf32>
    %104 = arith.mulf %103, %102 : vector<8x32xf32>
    %cst_36 = arith.constant 5.000000e-01 : f32
    %105 = vector.broadcast %cst_36 : f32 to vector<8x32xf32>
    %106 = arith.addf %104, %105 : vector<8x32xf32>
    %107 = vector.extract_strided_slice %96 {offsets = [0, 64], sizes = [8, 32], strides = [1, 1]} : vector<8x128xf32> to vector<8x32xf32>
    %108 = vector.extract_strided_slice %96 {offsets = [0, 96], sizes = [8, 32], strides = [1, 1]} : vector<8x128xf32> to vector<8x32xf32>
    %cst_37 = arith.constant 5.000000e-01 : f32
    %109 = vector.broadcast %cst_37 : f32 to vector<8x32xf32>
    %110 = arith.mulf %109, %108 : vector<8x32xf32>
    %cst_38 = arith.constant 5.000000e-01 : f32
    %111 = vector.broadcast %cst_38 : f32 to vector<8x32xf32>
    %112 = arith.addf %110, %111 : vector<8x32xf32>
    %113 = arith.mulf %106, %90 : vector<8x32xf32>
    %114 = arith.mulf %101, %107 : vector<8x32xf32>
    %115 = arith.addf %113, %114 : vector<8x32xf32>
    %116 = math.tanh %115 : vector<8x32xf32>
    %117 = arith.mulf %112, %116 : vector<8x32xf32>
    %118 = vector.extract_strided_slice %15 {offsets = [32, 0], sizes = [8, 128], strides = [1, 1]} : vector<64x128xf32> to vector<8x128xf32>
    %cst_39 = arith.constant dense<0.000000e+00> : vector<8x128xf32>
    %119 = tpu.matmul %117, %4, %cst_39 {dimension_numbers = #tpu.dot_dimension_numbers<[1], [0], [0], [1], [0, 0, 1, 1], [], []>} : vector<8x32xf32>, vector<32x128xf32>, vector<8x128xf32> -> vector<8x128xf32>
    %120 = arith.addf %118, %119 : vector<8x128xf32>
    %121 = math.tanh %120 : vector<8x128xf32>
    %122 = vector.extract_strided_slice %121 {offsets = [0, 0], sizes = [8, 32], strides = [1, 1]} : vector<8x128xf32> to vector<8x32xf32>
    %cst_40 = arith.constant 5.000000e-01 : f32
    %123 = vector.broadcast %cst_40 : f32 to vector<8x32xf32>
    %124 = arith.mulf %123, %122 : vector<8x32xf32>
    %cst_41 = arith.constant 5.000000e-01 : f32
    %125 = vector.broadcast %cst_41 : f32 to vector<8x32xf32>
    %126 = arith.addf %124, %125 : vector<8x32xf32>
    %127 = vector.extract_strided_slice %121 {offsets = [0, 32], sizes = [8, 32], strides = [1, 1]} : vector<8x128xf32> to vector<8x32xf32>
    %cst_42 = arith.constant 5.000000e-01 : f32
    %128 = vector.broadcast %cst_42 : f32 to vector<8x32xf32>
    %129 = arith.mulf %128, %127 : vector<8x32xf32>
    %cst_43 = arith.constant 5.000000e-01 : f32
    %130 = vector.broadcast %cst_43 : f32 to vector<8x32xf32>
    %131 = arith.addf %129, %130 : vector<8x32xf32>
    %132 = vector.extract_strided_slice %121 {offsets = [0, 64], sizes = [8, 32], strides = [1, 1]} : vector<8x128xf32> to vector<8x32xf32>
    %133 = vector.extract_strided_slice %121 {offsets = [0, 96], sizes = [8, 32], strides = [1, 1]} : vector<8x128xf32> to vector<8x32xf32>
    %cst_44 = arith.constant 5.000000e-01 : f32
    %134 = vector.broadcast %cst_44 : f32 to vector<8x32xf32>
    %135 = arith.mulf %134, %133 : vector<8x32xf32>
    %cst_45 = arith.constant 5.000000e-01 : f32
    %136 = vector.broadcast %cst_45 : f32 to vector<8x32xf32>
    %137 = arith.addf %135, %136 : vector<8x32xf32>
    %138 = arith.mulf %131, %115 : vector<8x32xf32>
    %139 = arith.mulf %126, %132 : vector<8x32xf32>
    %140 = arith.addf %138, %139 : vector<8x32xf32>
    %141 = math.tanh %140 : vector<8x32xf32>
    %142 = arith.mulf %137, %141 : vector<8x32xf32>
    %143 = vector.extract_strided_slice %15 {offsets = [40, 0], sizes = [8, 128], strides = [1, 1]} : vector<64x128xf32> to vector<8x128xf32>
    %cst_46 = arith.constant dense<0.000000e+00> : vector<8x128xf32>
    %144 = tpu.matmul %142, %4, %cst_46 {dimension_numbers = #tpu.dot_dimension_numbers<[1], [0], [0], [1], [0, 0, 1, 1], [], []>} : vector<8x32xf32>, vector<32x128xf32>, vector<8x128xf32> -> vector<8x128xf32>
    %145 = arith.addf %143, %144 : vector<8x128xf32>
    %146 = math.tanh %145 : vector<8x128xf32>
    %147 = vector.extract_strided_slice %146 {offsets = [0, 0], sizes = [8, 32], strides = [1, 1]} : vector<8x128xf32> to vector<8x32xf32>
    %cst_47 = arith.constant 5.000000e-01 : f32
    %148 = vector.broadcast %cst_47 : f32 to vector<8x32xf32>
    %149 = arith.mulf %148, %147 : vector<8x32xf32>
    %cst_48 = arith.constant 5.000000e-01 : f32
    %150 = vector.broadcast %cst_48 : f32 to vector<8x32xf32>
    %151 = arith.addf %149, %150 : vector<8x32xf32>
    %152 = vector.extract_strided_slice %146 {offsets = [0, 32], sizes = [8, 32], strides = [1, 1]} : vector<8x128xf32> to vector<8x32xf32>
    %cst_49 = arith.constant 5.000000e-01 : f32
    %153 = vector.broadcast %cst_49 : f32 to vector<8x32xf32>
    %154 = arith.mulf %153, %152 : vector<8x32xf32>
    %cst_50 = arith.constant 5.000000e-01 : f32
    %155 = vector.broadcast %cst_50 : f32 to vector<8x32xf32>
    %156 = arith.addf %154, %155 : vector<8x32xf32>
    %157 = vector.extract_strided_slice %146 {offsets = [0, 64], sizes = [8, 32], strides = [1, 1]} : vector<8x128xf32> to vector<8x32xf32>
    %158 = vector.extract_strided_slice %146 {offsets = [0, 96], sizes = [8, 32], strides = [1, 1]} : vector<8x128xf32> to vector<8x32xf32>
    %cst_51 = arith.constant 5.000000e-01 : f32
    %159 = vector.broadcast %cst_51 : f32 to vector<8x32xf32>
    %160 = arith.mulf %159, %158 : vector<8x32xf32>
    %cst_52 = arith.constant 5.000000e-01 : f32
    %161 = vector.broadcast %cst_52 : f32 to vector<8x32xf32>
    %162 = arith.addf %160, %161 : vector<8x32xf32>
    %163 = arith.mulf %156, %140 : vector<8x32xf32>
    %164 = arith.mulf %151, %157 : vector<8x32xf32>
    %165 = arith.addf %163, %164 : vector<8x32xf32>
    %166 = math.tanh %165 : vector<8x32xf32>
    %167 = arith.mulf %162, %166 : vector<8x32xf32>
    %168 = vector.extract_strided_slice %15 {offsets = [48, 0], sizes = [8, 128], strides = [1, 1]} : vector<64x128xf32> to vector<8x128xf32>
    %cst_53 = arith.constant dense<0.000000e+00> : vector<8x128xf32>
    %169 = tpu.matmul %167, %4, %cst_53 {dimension_numbers = #tpu.dot_dimension_numbers<[1], [0], [0], [1], [0, 0, 1, 1], [], []>} : vector<8x32xf32>, vector<32x128xf32>, vector<8x128xf32> -> vector<8x128xf32>
    %170 = arith.addf %168, %169 : vector<8x128xf32>
    %171 = math.tanh %170 : vector<8x128xf32>
    %172 = vector.extract_strided_slice %171 {offsets = [0, 0], sizes = [8, 32], strides = [1, 1]} : vector<8x128xf32> to vector<8x32xf32>
    %cst_54 = arith.constant 5.000000e-01 : f32
    %173 = vector.broadcast %cst_54 : f32 to vector<8x32xf32>
    %174 = arith.mulf %173, %172 : vector<8x32xf32>
    %cst_55 = arith.constant 5.000000e-01 : f32
    %175 = vector.broadcast %cst_55 : f32 to vector<8x32xf32>
    %176 = arith.addf %174, %175 : vector<8x32xf32>
    %177 = vector.extract_strided_slice %171 {offsets = [0, 32], sizes = [8, 32], strides = [1, 1]} : vector<8x128xf32> to vector<8x32xf32>
    %cst_56 = arith.constant 5.000000e-01 : f32
    %178 = vector.broadcast %cst_56 : f32 to vector<8x32xf32>
    %179 = arith.mulf %178, %177 : vector<8x32xf32>
    %cst_57 = arith.constant 5.000000e-01 : f32
    %180 = vector.broadcast %cst_57 : f32 to vector<8x32xf32>
    %181 = arith.addf %179, %180 : vector<8x32xf32>
    %182 = vector.extract_strided_slice %171 {offsets = [0, 64], sizes = [8, 32], strides = [1, 1]} : vector<8x128xf32> to vector<8x32xf32>
    %183 = vector.extract_strided_slice %171 {offsets = [0, 96], sizes = [8, 32], strides = [1, 1]} : vector<8x128xf32> to vector<8x32xf32>
    %cst_58 = arith.constant 5.000000e-01 : f32
    %184 = vector.broadcast %cst_58 : f32 to vector<8x32xf32>
    %185 = arith.mulf %184, %183 : vector<8x32xf32>
    %cst_59 = arith.constant 5.000000e-01 : f32
    %186 = vector.broadcast %cst_59 : f32 to vector<8x32xf32>
    %187 = arith.addf %185, %186 : vector<8x32xf32>
    %188 = arith.mulf %181, %165 : vector<8x32xf32>
    %189 = arith.mulf %176, %182 : vector<8x32xf32>
    %190 = arith.addf %188, %189 : vector<8x32xf32>
    %191 = math.tanh %190 : vector<8x32xf32>
    %192 = arith.mulf %187, %191 : vector<8x32xf32>
    %193 = vector.extract_strided_slice %15 {offsets = [56, 0], sizes = [8, 128], strides = [1, 1]} : vector<64x128xf32> to vector<8x128xf32>
    %cst_60 = arith.constant dense<0.000000e+00> : vector<8x128xf32>
    %194 = tpu.matmul %192, %4, %cst_60 {dimension_numbers = #tpu.dot_dimension_numbers<[1], [0], [0], [1], [0, 0, 1, 1], [], []>} : vector<8x32xf32>, vector<32x128xf32>, vector<8x128xf32> -> vector<8x128xf32>
    %195 = arith.addf %193, %194 : vector<8x128xf32>
    %196 = math.tanh %195 : vector<8x128xf32>
    %197 = vector.extract_strided_slice %196 {offsets = [0, 0], sizes = [8, 32], strides = [1, 1]} : vector<8x128xf32> to vector<8x32xf32>
    %cst_61 = arith.constant 5.000000e-01 : f32
    %198 = vector.broadcast %cst_61 : f32 to vector<8x32xf32>
    %199 = arith.mulf %198, %197 : vector<8x32xf32>
    %cst_62 = arith.constant 5.000000e-01 : f32
    %200 = vector.broadcast %cst_62 : f32 to vector<8x32xf32>
    %201 = arith.addf %199, %200 : vector<8x32xf32>
    %202 = vector.extract_strided_slice %196 {offsets = [0, 32], sizes = [8, 32], strides = [1, 1]} : vector<8x128xf32> to vector<8x32xf32>
    %cst_63 = arith.constant 5.000000e-01 : f32
    %203 = vector.broadcast %cst_63 : f32 to vector<8x32xf32>
    %204 = arith.mulf %203, %202 : vector<8x32xf32>
    %cst_64 = arith.constant 5.000000e-01 : f32
    %205 = vector.broadcast %cst_64 : f32 to vector<8x32xf32>
    %206 = arith.addf %204, %205 : vector<8x32xf32>
    %207 = vector.extract_strided_slice %196 {offsets = [0, 64], sizes = [8, 32], strides = [1, 1]} : vector<8x128xf32> to vector<8x32xf32>
    %208 = vector.extract_strided_slice %196 {offsets = [0, 96], sizes = [8, 32], strides = [1, 1]} : vector<8x128xf32> to vector<8x32xf32>
    %cst_65 = arith.constant 5.000000e-01 : f32
    %209 = vector.broadcast %cst_65 : f32 to vector<8x32xf32>
    %210 = arith.mulf %209, %208 : vector<8x32xf32>
    %cst_66 = arith.constant 5.000000e-01 : f32
    %211 = vector.broadcast %cst_66 : f32 to vector<8x32xf32>
    %212 = arith.addf %210, %211 : vector<8x32xf32>
    %213 = arith.mulf %206, %190 : vector<8x32xf32>
    %214 = arith.mulf %201, %207 : vector<8x32xf32>
    %215 = arith.addf %213, %214 : vector<8x32xf32>
    %216 = math.tanh %215 : vector<8x32xf32>
    %217 = arith.mulf %212, %216 : vector<8x32xf32>
    %cst_67 = arith.constant dense<0.000000e+00> : vector<8x128xf32>
    %218 = tpu.matmul %217, %5, %cst_67 {dimension_numbers = #tpu.dot_dimension_numbers<[1], [0], [0], [1], [0, 0, 1, 1], [], []>} : vector<8x32xf32>, vector<32x128xf32>, vector<8x128xf32> -> vector<8x128xf32>
    %219 = vector.broadcast %1 : vector<1x128xf32> to vector<8x128xf32>
    %220 = arith.addf %218, %219 : vector<8x128xf32>
    %c0_68 = arith.constant 0 : index
    %c0_69 = arith.constant 0 : index
    %221 = vector.load %arg2[%c0_68, %c0_69] : memref<8x128xf32, #tpu.memory_space<vmem>>, vector<8x128xf32>
    tpu.vector_store %arg2[%c0_68, %c0_69], %220 {strides = array<i32>} : memref<8x128xf32, #tpu.memory_space<vmem>>, vector<8x128xf32>,
    return
  }
}

</mosaic_0001>

<bundles_post_ra>
// kernel: cnn_lstm_forward.1
= control target key start
LH: loop header
LB: loop body
LE: loop exit
PB: predicated region body
PF: predicated region fallthrough
CT: control target
= control target key end

     0   :  { %vm55_vm0 = vcmask 130048   ;;  %v1628_v17 = vmov 0.0|0.0   ;;  %vm1629_vm1 = vmmov 0   ;;  %v1630_v50 = vmov 0.0   ;;  %s1631_s30 = smov 64   ;;  %s1632_s3 = smov 32   ;;  %s1921_s1 = inlined_call_operand.vmem [shape: f32[216,128], index: 1, kind: input, shape index: {}]   ;;  %s1922_s0 = inlined_call_operand.vmem [shape: f32[128,16], index: 0, kind: input, shape index: {}]   ;;  %s1923_s2 = inlined_call_operand.vmem [shape: f32[8,128], index: 2, kind: output, shape index: {}]  }
   0x1   :  { %v13_v0 = vld [vmem:[%s1921_s1 + $0x8] sm:$0xff]  ;;  %v14_v1 = vld [vmem:[%s1921_s1 + $0x10] sm:$0xff]  ;;  %v39_v2 = vld [vmem:[%s1922_s0] sm:$0xff]  ;;  %vm366_vm2 = vcmask 261120  }
   0x2   :  { %v1501_v3 = vpack.c.bf16 %v14_v1, %v13_v0  ;;  %1334 = vmatprep.mubr.msk.f32.mxu0 %vm55_vm0, %v39_v2  ;;  %v15_v4 = vld [vmem:[%s1921_s1 + $0x18] sm:$0xff]  ;;  %v16_v5 = vld [vmem:[%s1921_s1 + $0x20] sm:$0xff]  ;;  %v17_v9 = vld [vmem:[%s1921_s1 + $0x28] sm:$0xff] }
   0x3   :  { %v31_v6 = vld [vmem:[%s1921_s1 + $0x98] sm:$0xff]  ;;  %v1505_v7 = vpack.c.bf16 %v16_v5, %v15_v4  ;;  %v32_v8 = vld [vmem:[%s1921_s1 + $0xa0] sm:$0xff]  ;;  %v18_v10 = vld [vmem:[%s1921_s1 + $0x30] sm:$0xff] }
   0x4   :  { %1502 = vmatprep.subr.bf16.mxu0 %v1501_v3  ;;  %v40_v11 = vld [vmem:[%s1922_s0 + $0x8] sm:$0xff]  ;;  %v1679_v12 = vpack.c.bf16 %v32_v8, %v31_v6  ;;  %v1509_v13 = vpack.c.bf16 %v18_v10, %v17_v9  ;;  %v19_v14 = vld [vmem:[%s1921_s1 + $0x38] sm:$0xff]  ;;  %v20_v15 = vld [vmem:[%s1921_s1 + $0x40] sm:$0xff] }
   0x5   :  { %1504 = vmatpush3.bf16.msra.mxu0 %v1501_v3  ;;  %v41_v16 = vld [vmem:[%s1922_s0 + $0x10] sm:$0xff]  ;;  %1506 = vmatprep.subr.bf16.mxu1 %v1505_v7  ;;  %v42_v18 = vld [vmem:[%s1922_s0 + $0x18] sm:$0xff]  ;;  %v1513_v19 = vpack.c.bf16 %v20_v15, %v19_v14  ;;  %v21_v20 = vld [vmem:[%s1921_s1 + $0x48] sm:$0xff] }
   0x6   :  { %1537 = vmatprep.subr.bf16.mxu0 %v1628_v17  ;;  %1508 = vmatpush3.bf16.msra.mxu1 %v1505_v7  ;;  %v22_v21 = vld [vmem:[%s1921_s1 + $0x50] sm:$0xff]  ;;  %v33_v22 = vld [vmem:[%s1921_s1 + $0xa8] sm:$0xff]  ;;  %v43_v24 = vld [vmem:[%s1922_s0 + $0x20] sm:$0xff] }
   0x7   :  { %1510 = vmatprep.subr.bf16.mxu1 %v1509_v13  ;;  %v34_v23 = vld [vmem:[%s1921_s1 + $0xb0] sm:$0xff]  ;;  %v1517_v26 = vpack.c.bf16 %v22_v21, %v21_v20  ;;  %v44_v27 = vld [vmem:[%s1922_s0 + $0x28] sm:$0xff]  ;;  %v23_v28 = vld [vmem:[%s1921_s1 + $0x58] sm:$0xff] }
   0x8   :  { %1335 = vmatmul.mubr.msk.f32.vlgmr.msra.gmra.mrb[0].mxu0 %vm55_vm0, %v40_v11  ;;  %v1713_v25 = vpack.c.bf16 %v34_v23, %v33_v22  ;;  %v24_v29 = vld [vmem:[%s1921_s1 + $0x60] sm:$0xff]  ;;  %v45_v30 = vld [vmem:[%s1922_s0 + $0x30] sm:$0xff]  ;;  %v46_v32 = vld [vmem:[%s1922_s0 + $0x38] sm:$0xff] }
   0x9   :  { %1337 = vmatprep.mubr.msk.f32.mxu0 %vm55_vm0, %v41_v16  ;;  %1539 = vmatpush3.bf16.msra.mxu0 %v1679_v12  ;;  %v1521_v31 = vpack.c.bf16 %v24_v29, %v23_v28  ;;  %v25_v33 = vld [vmem:[%s1921_s1 + $0x68] sm:$0xff]  ;;  %v26_v34 = vld [vmem:[%s1921_s1 + $0x70] sm:$0xff]  ;;  %v47_v35 = vld [vmem:[%s1922_s0 + $0x40] sm:$0xff] }
   0xa   :  { %1540 = vmatprep.subr.bf16.mxu0 %v1628_v17  ;;  %1512 = vmatpush3.bf16.msra.mxu1 %v1509_v13  ;;  %v1525_v36 = vpack.c.bf16 %v26_v34, %v25_v33  ;;  %v48_v37 = vld [vmem:[%s1922_s0 + $0x48] sm:$0xff]  ;;  %v49_v38 = vld [vmem:[%s1922_s0 + $0x50] sm:$0xff]  ;;  %v50_v39 = vld [vmem:[%s1922_s0 + $0x58] sm:$0xff] }
   0xb   :  { %1514 = vmatprep.subr.bf16.mxu1 %v1513_v19  ;;  %v27_v40 = vld [vmem:[%s1921_s1 + $0x78] sm:$0xff]  ;;  %v28_v41 = vld [vmem:[%s1921_s1 + $0x80] sm:$0xff]  ;;  %v52_v44 = vld [vmem:[%s1922_s0 + $0x68] sm:$0xff] }
   0xc   :  { %1338 = vmatmul.mubr.msk.f32.gmra.mrb[2].mxu0 %vm55_vm0, %v42_v18  ;;  %v1529_v42 = vpack.c.bf16 %v28_v41, %v27_v40  ;;  %v51_v43 = vld [vmem:[%s1922_s0 + $0x60] sm:$0xff]  ;;  %v29_v45 = vld [vmem:[%s1921_s1 + $0x88] sm:$0xff]  ;;  %v30_v46 = vld [vmem:[%s1921_s1 + $0x90] sm:$0xff] }
   0xd   :  { %1340 = vmatprep.mubr.msk.f32.mxu0 %vm55_vm0, %v43_v24  ;;  %1542 = vmatpush3.bf16.msra.mxu0 %v1713_v25  ;;  %v1533_v47 = vpack.c.bf16 %v30_v46, %v29_v45  ;;  %v53_v48 = vld [vmem:[%s1922_s0 + $0x70] sm:$0xff]  ;;  %v54_v49 = vld [vmem:[%s1922_s0 + $0x78] sm:$0xff]  ;;  %v1806_v14 = vld [vmem:[%s1921_s1] ss:$0 sm:$0xff] }
   0xe   :  { %1543 = vmatprep.subr.bf16.mxu0 %v1628_v17  ;;  %1516 = vmatpush3.bf16.msra.mxu1 %v1513_v19 }
   0xf   :  { %1518 = vmatprep.subr.bf16.mxu1 %v1517_v26 }
  0x10   :  { %1341 = vmatmul.mubr.msk.f32.gmra.mrb[4].mxu0 %vm55_vm0, %v44_v27 }
  0x11   :  { %1343 = vmatprep.mubr.msk.f32.mxu0 %vm55_vm0, %v45_v30 }
  0x12   :  { %1520 = vmatpush3.bf16.msra.mxu1 %v1517_v26 }
  0x13   :  { %1522 = vmatprep.subr.bf16.mxu1 %v1521_v31 }
  0x14   :  { %1344 = vmatmul.mubr.msk.f32.gmra.mrb[6].mxu0 %vm55_vm0, %v46_v32 }
  0x15   :  { %1346 = vmatprep.mubr.msk.f32.mxu0 %vm55_vm0, %v47_v35 }
  0x16   :  { %1524 = vmatpush3.bf16.msra.mxu1 %v1521_v31 }
  0x17   :  { %1526 = vmatprep.subr.bf16.mxu1 %v1525_v36 }
  0x18   :  { %1347 = vmatmul.mubr.msk.f32.gmra.mrb[8].mxu0 %vm55_vm0, %v48_v37 }
  0x19   :  { %1349 = vmatprep.mubr.msk.f32.mxu0 %vm55_vm0, %v49_v38 }
  0x1a   :  { %1528 = vmatpush3.bf16.msra.mxu1 %v1525_v36 }
  0x1b   :  { %1530 = vmatprep.subr.bf16.mxu1 %v1529_v42 }
  0x1c   :  { %1350 = vmatmul.mubr.msk.f32.gmra.mrb[10].mxu0 %vm55_vm0, %v50_v39 }
  0x1d   :  { %1352 = vmatprep.mubr.msk.f32.mxu0 %vm55_vm0, %v51_v43 }
  0x1e   :  { %1532 = vmatpush3.bf16.msra.mxu1 %v1529_v42 }
  0x1f   :  { %1534 = vmatprep.subr.bf16.mxu1 %v1533_v47 }
  0x20   :  { %1353 = vmatmul.mubr.msk.f32.gmra.mrb[12].mxu0 %vm55_vm0, %v52_v44 }
  0x21   :  { %1355 = vmatprep.mubr.msk.f32.mxu0 %vm55_vm0, %v53_v48 }
  0x22   :  { %1536 = vmatpush3.bf16.msra.mxu1 %v1533_v47 }
  0x23   :  { %1549 = vmatprep.subr.bf16.mxu1 %v1628_v17 }
  0x24   :  { %1356 = vmatmul.mubr.msk.f32.gmra.mrb[14].mxu0 %vm55_vm0, %v54_v49 }
  0x25   :  { %1410 = vmatprep.mubr.msk.f32.mxu0 %vm1629_vm1, %v1630_v50 }
  0x28   :  { %1411 = vmatmul.mubr.f32.vlgmr.msra.gmra.mrb[16].mxu0 %v1630_v50 }
  0x29   :  { %1545 = vmatpush3.bf16.msra.mxu0 %v1679_v12  ;;  %1421 = vmatprep.mubr.msk.f32.mxu0 %vm1629_vm1, %v1630_v50 }
  0x2a   :  { %1546 = vmatprep.subr.bf16.mxu0 %v1628_v17 }
  0x2d   :  { %1548 = vmatpush3.bf16.msra.mxu0 %v1713_v25 }
  0x2e   :  { %1555 = vmatprep.subr.bf16.mxu0 %v1628_v17 }
  0xdb   :  { %v1336_v51 = vpop.f32.mrb[0].mxu0 }
  0xdc   :  { %v170_v52 = vpop.f32.mrb[1].mxu0 }
  0xdd   :  { %v249_v53 = vmax.f32 %v170_v52, %v1336_v51 }
  0xdf   :  { %v1339_v54 = vpop.f32.mrb[2].mxu0  ;;  %1390 = vmatprep.mubr.f32.mxu1 %v249_v53 }
  0xe0   :  { %v180_v55 = vpop.f32.mrb[3].mxu0 }
  0xe1   :  { %v250_v56 = vmax.f32 %v180_v55, %v1339_v54 }
  0xe3   :  { %1391 = vmatmul.mubr.f32.vlgmr.msra.gmra.mrb[0].mxu1 %v250_v56  ;;  %v1342_v57 = vpop.f32.mrb[4].mxu0 }
  0xe4   :  { %v190_v58 = vpop.f32.mrb[5].mxu0  ;;  %1551 = vmatpush3.bf16.msra.mxu1 %v1679_v12 }
  0xe5   :  { %v251_v59 = vmax.f32 %v190_v58, %v1342_v57  ;;  %1552 = vmatprep.subr.bf16.mxu1 %v1628_v17 }
  0xe7   :  { %v1345_v60 = vpop.f32.mrb[6].mxu0  ;;  %1393 = vmatprep.mubr.f32.mxu1 %v251_v59 }
  0xe8   :  { %v200_v61 = vpop.f32.mrb[7].mxu0  ;;  %1554 = vmatpush3.bf16.msra.mxu1 %v1713_v25 }
  0xe9   :  { %v252_v62 = vmax.f32 %v200_v61, %v1345_v60  ;;  %1561 = vmatprep.subr.bf16.mxu1 %v1628_v17 }
  0xeb   :  { %1394 = vmatmul.mubr.f32.gmra.mrb[2].mxu1 %v252_v62  ;;  %v1348_v63 = vpop.f32.mrb[8].mxu0 }
  0xec   :  { %v210_v0 = vpop.f32.mrb[9].mxu0 }
  0xed   :  { %v253_v1 = vmax.f32 %v210_v0, %v1348_v63 }
  0xef   :  { %v1351_v2 = vpop.f32.mrb[10].mxu0  ;;  %1396 = vmatprep.mubr.f32.mxu1 %v253_v1 }
  0xf0   :  { %v220_v3 = vpop.f32.mrb[11].mxu0 }
  0xf1   :  { %v254_v4 = vmax.f32 %v220_v3, %v1351_v2 }
  0xf3   :  { %1397 = vmatmul.mubr.f32.gmra.mrb[4].mxu1 %v254_v4  ;;  %v1354_v5 = vpop.f32.mrb[12].mxu0 }
  0xf4   :  { %v230_v6 = vpop.f32.mrb[13].mxu0 }
  0xf5   :  { %v255_v7 = vmax.f32 %v230_v6, %v1354_v5 }
  0xf7   :  { %v1357_v8 = vpop.f32.mrb[14].mxu0  ;;  %1399 = vmatprep.mubr.f32.mxu1 %v255_v7 }
  0xf8   :  { %v240_v9 = vpop.f32.mrb[15].mxu0 }
  0xf9   :  { %v256_v10 = vmax.f32 %v240_v9, %v1357_v8 }
  0xfb   :  { %1400 = vmatmul.mubr.f32.gmra.mrb[6].mxu1 %v256_v10  ;;  %v436_v11 = vpop.f32.mrb[16].mxu0 }
  0xfc   :  { %1432 = vmatprep.mubr.msk.f32.mxu1 %vm1629_vm1, %v1630_v50  ;;  %v1412_v13 = vpop.f32.mrb[17].mxu0 }
 0x1b6   :  { %v1392_v15 = vpop.f32.mrb[0].mxu1 }
 0x1b7   :  { %v327_v16 = vpop.f32.mrb[1].mxu1  ;;  %v333_v39 = vadd.f32 %v1392_v15, %v1806_v14 }
 0x1b8   :  { %v328_v18 = vadd.f32 %v1806_v14, %v327_v16 }
 0x1ba   :  { %v440_v19 = vadd.f32 %v436_v11, %v328_v18 }
 0x1bc   :  { %1596 = vtanh.f32 %v440_v19 }
 0x1be   :  { %v1809_v20 = vpop.f32.mrb[2].mxu1 }
 0x1bf   :  { %v337_v21 = vpop.f32.mrb[3].mxu1  ;;  %v343_v8 = vadd.f32 %v1809_v20, %v1806_v14 }
 0x1c0   :  { %v338_v56 = vadd.f32 %v1806_v14, %v337_v21 }
 0x1c6   :  { %v1597_v22 = vpop.eup %1596  ;;  %v1811_v23 = vpop.f32.mrb[4].mxu1 }
 0x1c7   :  { %446 = vrot.lane.b32.xlu0 %v1597_v22, %s1631_s30  ;;  %v1814_v24 = vpop.f32.mrb[5].mxu1  ;;  %v442_v28 = vmul.f32 0.5, %v1597_v22 }
 0x1c9   :  { %v443_v29 = vadd.f32 0.5, %v442_v28 }
 0x1cb   :  { %v444_v32 = vmul.f32 0.0, %v443_v29 }
 0x1ce   :  { %v1816_v26 = vpop.f32.mrb[6].mxu1 }
 0x1cf   :  { %v1818_v27 = vpop.f32.mrb[7].mxu1 }
 0x239   :  { %v447_v30 = vpop.permute.xlu0 %446 }
 0x23a   :  { %v449_v31 = vmul.f32 %v447_v30, %v443_v29 }
 0x23c   :  { %451 = vrot.lane.b32.xlu0 %v449_v31, %s1632_s3 }
 0x2ae   :  { %v452_v33 = vpop.permute.xlu0 %451 }
 0x2af   :  { %v454_v34 = vadd.f32 %v452_v33, %v444_v32  ;;  %v348_v32 = vadd.f32 %v1806_v14, %v1814_v24 }
 0x2b1   :  { %1598 = vtanh.f32 %v454_v34 }
 0x2bb   :  { %v1599_v35 = vpop.eup %1598 }
 0x2bc   :  { %457 = vrot.lane.b32.xlu1 %v1599_v35, %s1631_s30 }
 0x32e   :  { %v458_v36 = vpop.permute.xlu1 %457 }
 0x32f   :  { %v460_v37 = vmul.f32 %v458_v36, %v443_v29 }
 0x331   :  { %462 = vrot.lane.b32.xlu1 %v460_v37, %s1632_s3 }
 0x3a3   :  { %v463_v38 = vpop.permute.xlu1 %462 }
 0x3a4   :  { %1422 = vmatmul.mubr.msk.f32.vlgmr.msra.gmra.mrb[18].mxu0 %vm366_vm2, %v463_v38 }
 0x3a5   :  { %1557 = vmatpush3.bf16.msra.mxu0 %v1679_v12  ;;  %1443 = vmatprep.mubr.msk.f32.mxu0 %vm1629_vm1, %v1630_v50 }
 0x3a6   :  { %1558 = vmatprep.subr.bf16.mxu0 %v1628_v17 }
 0x3a9   :  { %1560 = vmatpush3.bf16.msra.mxu0 %v1713_v25 }
 0x3aa   :  { %1567 = vmatprep.subr.bf16.mxu0 %v1628_v17 }
 0x477   :  { %v532_v40 = vpop.f32.mrb[18].mxu0 }
 0x478   :  { %v536_v41 = vadd.f32 %v532_v40, %v333_v39  ;;  %v1423_v42 = vpop.f32.mrb[19].mxu0 }
 0x47a   :  { %1600 = vtanh.f32 %v536_v41 }
 0x484   :  { %v1601_v43 = vpop.eup %1600 }
 0x485   :  { %542 = vrot.lane.b32.xlu0 %v1601_v43, %s1631_s30  ;;  %v538_v44 = vmul.f32 0.5, %v1601_v43 }
 0x487   :  { %v539_v45 = vadd.f32 0.5, %v538_v44 }
 0x489   :  { %v540_v48 = vmul.f32 %v539_v45, %v454_v34 }
 0x4f7   :  { %v543_v46 = vpop.permute.xlu0 %542 }
 0x4f8   :  { %v545_v47 = vmul.f32 %v543_v46, %v539_v45 }
 0x4fa   :  { %547 = vrot.lane.b32.xlu1 %v545_v47, %s1632_s3  ;;  %v353_v47 = vadd.f32 %v1811_v23, %v1806_v14 }
 0x56c   :  { %v548_v49 = vpop.permute.xlu1 %547 }
 0x56d   :  { %v550_v51 = vadd.f32 %v548_v49, %v540_v48 }
 0x56f   :  { %1602 = vtanh.f32 %v550_v51 }
 0x579   :  { %v1603_v52 = vpop.eup %1602 }
 0x57a   :  { %553 = vrot.lane.b32.xlu0 %v1603_v52, %s1631_s30 }
 0x5ec   :  { %v554_v53 = vpop.permute.xlu0 %553 }
 0x5ed   :  { %v556_v54 = vmul.f32 %v554_v53, %v539_v45 }
 0x5ef   :  { %558 = vrot.lane.b32.xlu1 %v556_v54, %s1632_s3 }
 0x661   :  { %v559_v55 = vpop.permute.xlu1 %558 }
 0x662   :  { %1433 = vmatmul.mubr.msk.f32.vlgmr.msra.gmra.mrb[8].mxu1 %vm366_vm2, %v559_v55 }
 0x663   :  { %1563 = vmatpush3.bf16.msra.mxu1 %v1679_v12  ;;  %1454 = vmatprep.mubr.msk.f32.mxu1 %vm1629_vm1, %v1630_v50 }
 0x664   :  { %1564 = vmatprep.subr.bf16.mxu1 %v1628_v17 }
 0x667   :  { %1566 = vmatpush3.bf16.msra.mxu1 %v1713_v25 }
 0x668   :  { %1573 = vmatprep.subr.bf16.mxu1 %v1628_v17 }
 0x735   :  { %v628_v57 = vpop.f32.mrb[8].mxu1 }
 0x736   :  { %v632_v58 = vadd.f32 %v628_v57, %v338_v56  ;;  %v1434_v59 = vpop.f32.mrb[9].mxu1 }
 0x738   :  { %1604 = vtanh.f32 %v632_v58 }
 0x742   :  { %v1605_v60 = vpop.eup %1604 }
 0x743   :  { %638 = vrot.lane.b32.xlu0 %v1605_v60, %s1631_s30  ;;  %v634_v61 = vmul.f32 0.5, %v1605_v60 }
 0x745   :  { %v635_v62 = vadd.f32 0.5, %v634_v61  ;;  %v358_v61 = vadd.f32 %v1806_v14, %v1818_v27 }
 0x747   :  { %v636_v1 = vmul.f32 %v635_v62, %v550_v51 }
 0x7b5   :  { %v639_v63 = vpop.permute.xlu0 %638 }
 0x7b6   :  { %v641_v0 = vmul.f32 %v639_v63, %v635_v62 }
 0x7b8   :  { %643 = vrot.lane.b32.xlu1 %v641_v0, %s1632_s3 }
 0x82a   :  { %v644_v2 = vpop.permute.xlu1 %643 }
 0x82b   :  { %v646_v3 = vadd.f32 %v644_v2, %v636_v1 }
 0x82d   :  { %1606 = vtanh.f32 %v646_v3 }
 0x837   :  { %v1607_v4 = vpop.eup %1606 }
 0x838   :  { %649 = vrot.lane.b32.xlu0 %v1607_v4, %s1631_s30 }
 0x8aa   :  { %v650_v5 = vpop.permute.xlu0 %649 }
 0x8ab   :  { %v652_v6 = vmul.f32 %v650_v5, %v635_v62 }
 0x8ad   :  { %654 = vrot.lane.b32.xlu1 %v652_v6, %s1632_s3 }
 0x91f   :  { %v655_v7 = vpop.permute.xlu1 %654 }
 0x920   :  { %1444 = vmatmul.mubr.msk.f32.vlgmr.msra.gmra.mrb[20].mxu0 %vm366_vm2, %v655_v7 }
 0x921   :  { %1569 = vmatpush3.bf16.msra.mxu0 %v1679_v12  ;;  %1465 = vmatprep.mubr.msk.f32.mxu0 %vm1629_vm1, %v1630_v50 }
 0x922   :  { %1570 = vmatprep.subr.bf16.mxu0 %v1628_v17 }
 0x925   :  { %1572 = vmatpush3.bf16.msra.mxu0 %v1713_v25 }
 0x926   :  { %1579 = vmatprep.subr.bf16.mxu0 %v1628_v17 }
 0x9f3   :  { %v724_v9 = vpop.f32.mrb[20].mxu0 }
 0x9f4   :  { %v728_v10 = vadd.f32 %v724_v9, %v343_v8  ;;  %v1445_v11 = vpop.f32.mrb[21].mxu0 }
 0x9f5   :  { %v363_v11 = vadd.f32 %v1816_v26, %v1806_v14  ;;  %v35_v14 = vld [vmem:[%s1921_s1 + $0xb8] sm:$0xff]  ;;  %v36_v26 = vld [vmem:[%s1921_s1 + $0xc0] sm:$0xff] }
 0x9f6   :  { %1608 = vtanh.f32 %v728_v10 }
 0xa00   :  { %v1609_v13 = vpop.eup %1608 }
 0xa01   :  { %734 = vrot.lane.b32.xlu0 %v1609_v13, %s1631_s30  ;;  %v730_v15 = vmul.f32 0.5, %v1609_v13 }
 0xa03   :  { %v731_v16 = vadd.f32 0.5, %v730_v15 }
 0xa05   :  { %v732_v21 = vmul.f32 %v731_v16, %v646_v3 }
 0xa73   :  { %v735_v18 = vpop.permute.xlu0 %734 }
 0xa74   :  { %v737_v19 = vmul.f32 %v735_v18, %v731_v16 }
 0xa76   :  { %739 = vrot.lane.b32.xlu1 %v737_v19, %s1632_s3 }
 0xae8   :  { %v740_v22 = vpop.permute.xlu1 %739 }
 0xae9   :  { %v742_v28 = vadd.f32 %v740_v22, %v732_v21 }
 0xaeb   :  { %1610 = vtanh.f32 %v742_v28 }
 0xaf5   :  { %v1611_v29 = vpop.eup %1610 }
 0xaf6   :  { %745 = vrot.lane.b32.xlu0 %v1611_v29, %s1631_s30 }
 0xb68   :  { %v746_v20 = vpop.permute.xlu0 %745 }
 0xb69   :  { %v748_v30 = vmul.f32 %v746_v20, %v731_v16 }
 0xb6b   :  { %750 = vrot.lane.b32.xlu1 %v748_v30, %s1632_s3 }
 0xbdd   :  { %v751_v31 = vpop.permute.xlu1 %750 }
 0xbde   :  { %1455 = vmatmul.mubr.msk.f32.vlgmr.msra.gmra.mrb[10].mxu1 %vm366_vm2, %v751_v31  ;;  %v37_v31 = vld [vmem:[%s1921_s1 + $0xc8] sm:$0xff] }
 0xbdf   :  { %1575 = vmatpush3.bf16.msra.mxu1 %v1679_v12  ;;  %1476 = vmatprep.mubr.msk.f32.mxu1 %vm1629_vm1, %v1630_v50 }
 0xbe0   :  { %1576 = vmatprep.subr.bf16.mxu1 %v1628_v17 }
 0xbe3   :  { %1578 = vmatpush3.bf16.msra.mxu1 %v1713_v25 }
 0xbe4   :  { %1585 = vmatprep.subr.bf16.mxu1 %v1628_v17 }
 0xcb1   :  { %v820_v33 = vpop.f32.mrb[10].mxu1 }
 0xcb2   :  { %v824_v34 = vadd.f32 %v820_v33, %v348_v32  ;;  %v1456_v35 = vpop.f32.mrb[11].mxu1  ;;  %v1586_v32 = vpack.c.bf16 %v36_v26, %v35_v14  ;;  %v38_v33 = vld [vmem:[%s1921_s1 + $0xd0] sm:$0xff] }
 0xcb4   :  { %1612 = vtanh.f32 %v824_v34  ;;  %v1589_v34 = vpack.c.bf16 %v38_v33, %v37_v31 }
 0xcbe   :  { %v1613_v36 = vpop.eup %1612 }
 0xcbf   :  { %830 = vrot.lane.b32.xlu0 %v1613_v36, %s1631_s30  ;;  %v826_v37 = vmul.f32 0.5, %v1613_v36 }
 0xcc1   :  { %v827_v38 = vadd.f32 0.5, %v826_v37 }
 0xcc3   :  { %v828_v41 = vmul.f32 %v827_v38, %v742_v28 }
 0xd31   :  { %v831_v39 = vpop.permute.xlu0 %830 }
 0xd32   :  { %v833_v40 = vmul.f32 %v831_v39, %v827_v38  ;;  %v1241_v39 = vld [vmem:[%s1921_s1 + $0x1] ss:$0 sm:$0xff] }
 0xd34   :  { %835 = vrot.lane.b32.xlu1 %v833_v40, %s1632_s3 }
 0xda6   :  { %v836_v42 = vpop.permute.xlu1 %835 }
 0xda7   :  { %v838_v43 = vadd.f32 %v836_v42, %v828_v41 }
 0xda9   :  { %1614 = vtanh.f32 %v838_v43 }
 0xdb3   :  { %v1615_v44 = vpop.eup %1614 }
 0xdb4   :  { %841 = vrot.lane.b32.xlu0 %v1615_v44, %s1631_s30 }
 0xe26   :  { %v842_v24 = vpop.permute.xlu0 %841 }
 0xe27   :  { %v844_v45 = vmul.f32 %v842_v24, %v827_v38 }
 0xe29   :  { %846 = vrot.lane.b32.xlu1 %v844_v45, %s1632_s3 }
 0xe9b   :  { %v847_v46 = vpop.permute.xlu1 %846 }
 0xe9c   :  { %1466 = vmatmul.mubr.msk.f32.vlgmr.msra.gmra.mrb[22].mxu0 %vm366_vm2, %v847_v46 }
 0xe9d   :  { %1581 = vmatpush3.bf16.msra.mxu0 %v1679_v12  ;;  %1487 = vmatprep.mubr.msk.f32.mxu0 %vm1629_vm1, %v1630_v50 }
 0xe9e   :  { %1582 = vmatprep.subr.bf16.mxu0 %v1628_v17 }
 0xea1   :  { %1584 = vmatpush3.bf16.msra.mxu0 %v1713_v25 }
 0xf6f   :  { %v916_v48 = vpop.f32.mrb[22].mxu0 }
 0xf70   :  { %v920_v49 = vadd.f32 %v916_v48, %v353_v47  ;;  %v1467_v51 = vpop.f32.mrb[23].mxu0 }
 0xf72   :  { %1616 = vtanh.f32 %v920_v49 }
 0xf7c   :  { %v1617_v52 = vpop.eup %1616 }
 0xf7d   :  { %926 = vrot.lane.b32.xlu0 %v1617_v52, %s1631_s30  ;;  %v922_v53 = vmul.f32 0.5, %v1617_v52 }
 0xf7f   :  { %v923_v54 = vadd.f32 0.5, %v922_v53 }
 0xf81   :  { %v924_v56 = vmul.f32 %v923_v54, %v838_v43 }
 0xfef   :  { %v927_v12 = vpop.permute.xlu0 %926 }
 0xff0   :  { %v929_v55 = vmul.f32 %v927_v12, %v923_v54 }
 0xff2   :  { %931 = vrot.lane.b32.xlu1 %v929_v55, %s1632_s3 }
0x1064   :  { %v932_v57 = vpop.permute.xlu1 %931 }
0x1065   :  { %v934_v58 = vadd.f32 %v932_v57, %v924_v56 }
0x1067   :  { %1618 = vtanh.f32 %v934_v58 }
0x1071   :  { %v1619_v25 = vpop.eup %1618 }
0x1072   :  { %937 = vrot.lane.b32.xlu0 %v1619_v25, %s1631_s30 }
0x10e4   :  { %v938_v23 = vpop.permute.xlu0 %937 }
0x10e5   :  { %v940_v59 = vmul.f32 %v938_v23, %v923_v54 }
0x10e7   :  { %942 = vrot.lane.b32.xlu1 %v940_v59, %s1632_s3 }
0x1159   :  { %v943_v60 = vpop.permute.xlu1 %942 }
0x115a   :  { %1477 = vmatmul.mubr.msk.f32.vlgmr.msra.gmra.mrb[12].mxu1 %vm366_vm2, %v943_v60 }
0x115b   :  { %1498 = vmatprep.mubr.msk.f32.mxu1 %vm1629_vm1, %v1630_v50  ;;  %1587 = vmatpush3.bf16.msra.mxu1 %v1586_v32 }
0x115c   :  { %1588 = vmatprep.subr.bf16.mxu1 %v1628_v17 }
0x115f   :  { %1590 = vmatpush3.bf16.msra.mxu1 %v1589_v34 }
0x122d   :  { %v1012_v62 = vpop.f32.mrb[12].mxu1 }
0x122e   :  { %v1016_v63 = vadd.f32 %v1012_v62, %v358_v61  ;;  %v1478_v0 = vpop.f32.mrb[13].mxu1 }
0x1230   :  { %1620 = vtanh.f32 %v1016_v63 }
0x123a   :  { %v1621_v1 = vpop.eup %1620 }
0x123b   :  { %1022 = vrot.lane.b32.xlu0 %v1621_v1, %s1631_s30  ;;  %v1018_v2 = vmul.f32 0.5, %v1621_v1 }
0x123d   :  { %v1019_v3 = vadd.f32 0.5, %v1018_v2 }
0x123f   :  { %v1020_v6 = vmul.f32 %v1019_v3, %v934_v58 }
0x12ad   :  { %v1023_v4 = vpop.permute.xlu0 %1022 }
0x12ae   :  { %v1025_v5 = vmul.f32 %v1023_v4, %v1019_v3 }
0x12b0   :  { %1027 = vrot.lane.b32.xlu1 %v1025_v5, %s1632_s3 }
0x1322   :  { %v1028_v7 = vpop.permute.xlu1 %1027 }
0x1323   :  { %v1030_v8 = vadd.f32 %v1028_v7, %v1020_v6 }
0x1325   :  { %1622 = vtanh.f32 %v1030_v8 }
0x132f   :  { %v1623_v50 = vpop.eup %1622 }
0x1330   :  { %1033 = vrot.lane.b32.xlu0 %v1623_v50, %s1631_s30 }
0x13a2   :  { %v1034_v27 = vpop.permute.xlu0 %1033 }
0x13a3   :  { %v1036_v9 = vmul.f32 %v1034_v27, %v1019_v3 }
0x13a5   :  { %1038 = vrot.lane.b32.xlu1 %v1036_v9, %s1632_s3 }
0x1417   :  { %v1039_v10 = vpop.permute.xlu1 %1038 }
0x1418   :  { %1488 = vmatmul.mubr.msk.f32.vlgmr.msra.gmra.mrb[24].mxu0 %vm366_vm2, %v1039_v10 }
0x14eb   :  { %v1108_v13 = vpop.f32.mrb[24].mxu0 }
0x14ec   :  { %v1112_v15 = vadd.f32 %v1108_v13, %v363_v11  ;;  %v1489_v16 = vpop.f32.mrb[25].mxu0 }
0x14ee   :  { %1624 = vtanh.f32 %v1112_v15 }
0x14f8   :  { %v1625_v18 = vpop.eup %1624 }
0x14f9   :  { %1118 = vrot.lane.b32.xlu0 %v1625_v18, %s1631_s30  ;;  %v1114_v19 = vmul.f32 0.5, %v1625_v18 }
0x14fb   :  { %v1115_v21 = vadd.f32 0.5, %v1114_v19 }
0x14fd   :  { %v1116_v29 = vmul.f32 %v1115_v21, %v1030_v8 }
0x156b   :  { %v1119_v22 = vpop.permute.xlu0 %1118 }
0x156c   :  { %v1121_v28 = vmul.f32 %v1119_v22, %v1115_v21 }
0x156e   :  { %1123 = vrot.lane.b32.xlu1 %v1121_v28, %s1632_s3 }
0x15e0   :  { %v1124_v20 = vpop.permute.xlu1 %1123 }
0x15e1   :  { %v1126_v30 = vadd.f32 %v1124_v20, %v1116_v29 }
0x15e3   :  { %1626 = vtanh.f32 %v1126_v30 }
0x15ed   :  { %v1627_v35 = vpop.eup %1626 }
0x15ee   :  { %1129 = vrot.lane.b32.xlu0 %v1627_v35, %s1631_s30 }
0x1660   :  { %v1130_v36 = vpop.permute.xlu0 %1129 }
0x1661   :  { %v1132_v37 = vmul.f32 %v1130_v36, %v1115_v21 }
0x1663   :  { %1138 = vrot.lane.b32.xlu1 %v1132_v37, %s1632_s3 }
0x16d5   :  { %v1139_v38 = vpop.permute.xlu1 %1138 }
0x16d6   :  { %1499 = vmatmul.mubr.msk.f32.vlgmr.msra.gmra.mrb[14].mxu1 %vm366_vm2, %v1139_v38 }
0x17a9   :  { %v1208_v40 = vpop.f32.mrb[14].mxu1 }
0x17aa   :  { %v1209_v41 = vadd.f32 %v1241_v39, %v1208_v40  ;;  %v1500_v42 = vpop.f32.mrb[15].mxu1 }
0x17ac   :  { %1212 = vst [vmem:[%s1923_s2] sm:$0xff] %v1209_v41 }

</bundles_post_ra>
